<compile_context>
chip_gen: v6e
topology: v6e:2x2x1
jax: 0.10.0
libtpu: 0.0.40
codegen_flags: <defaults>
</compile_context>

<pallas_src>
import functools

import jax
import jax.numpy as jnp
import numpy as np
from jax import lax
from jax.experimental import pallas as pl
from jax.experimental.pallas import tpu as pltpu


def _mha_kernel(x_ref, w_ref, b_ref, o_ref, *, heads, head_dim, compute_dtype):
    # One grid step == one batch element (all heads processed in-kernel).
    x = x_ref[0]                                    # (t, d)    f32
    w = w_ref[...]                                  # (d, 3d)   compute_dtype
    bias = b_ref[...]                               # (1, 3d)   f32
    d = heads * head_dim
    hd = head_dim
    scale = 1.0 / (float(hd) ** 0.5)

    # Fused QKV projection for all heads: one MXU matmul, f32 accumulation.
    qkv = jnp.dot(x.astype(compute_dtype), w,
                  preferred_element_type=jnp.float32) + bias        # (t, 3d) f32

    # Fold the softmax scale into q (t*d elements instead of t*t per head).
    q = qkv[:, 0:d] * scale                          # (t, d)
    k = qkv[:, d:2 * d]                              # (t, d)
    v = qkv[:, 2 * d:3 * d]                          # (t, d)

    # NOTE: the reference module computes softmax(K @ Q^T / sqrt(hd)) @ V
    # (K and Q swapped vs. standard attention); reproduce that exactly.
    head_outs = []
    for h in range(heads):                           # static unroll (heads small)
        lo = h * hd
        qh = q[:, lo:lo + hd].astype(compute_dtype)  # (t, hd)
        kh = k[:, lo:lo + hd].astype(compute_dtype)  # (t, hd)
        vh = v[:, lo:lo + hd].astype(compute_dtype)  # (t, hd)

        # Contract the last dims directly -- no explicit transpose of q.
        s = lax.dot_general(kh, qh,
                            dimension_numbers=(((1,), (1,)), ((), ())),
                            preferred_element_type=jnp.float32)     # (t, t)

        s_max = jnp.max(s, axis=-1, keepdims=True)
        p = jnp.exp(s - s_max)                                       # (t, t)
        row_sum = jnp.sum(p, axis=-1, keepdims=True)                 # (t, 1)

        # Normalize AFTER P @ V: scales t*hd elements via the EUP reciprocal.
        # (use approx=False if tighter numerics than ~2e-2 are required)
        pv = jnp.dot(p.astype(compute_dtype), vh,
                     preferred_element_type=jnp.float32)             # (t, hd)
        head_outs.append(pv * pl.reciprocal(row_sum, approx=True))

    # Lane-dense (t, d) slab, stored once.  Head order along lanes matches the
    # reference's swapaxes(1,2).reshape(b, t, d) concatenation.
    out = jnp.concatenate(head_outs, axis=-1)        # (t, d)
    o_ref[0] = out.astype(o_ref.dtype)


def multihead_attention(x, wk, bk, wq, bq, wv, bv, heads,
                        compute_dtype=jnp.bfloat16):
    """x: (b, t, d) float32.  wk/wq/wv: (d, d) torch layout (out, in).  b*: (d,)."""
    b, t, d = x.shape
    assert d % heads == 0
    hd = d // heads

    # --- wrapper-side weight packing (one-time layout plumbing) -------------
    # torch Linear: y = x @ W.T + bias.  Pack [Q | K | V] along the output dim
    # so the kernel does a single (t, d) @ (d, 3d) matmul.  Weights pre-cast to
    # the MXU input dtype (halves weight DMA); bias stays f32 (post-acc add).
    w_packed = jnp.concatenate([wq.T, wk.T, wv.T], axis=1).astype(compute_dtype)   # (d, 3d)
    b_packed = jnp.concatenate([bq, bk, bv]).reshape(1, 3 * d).astype(jnp.float32)  # (1, 3d)

    kernel = functools.partial(_mha_kernel, heads=heads, head_dim=hd,
                               compute_dtype=compute_dtype)

    return pl.pallas_call(
        kernel,
        out_shape=jax.ShapeDtypeStruct((b, t, d), x.dtype),
        grid_spec=pltpu.PrefetchScalarGridSpec(
            num_scalar_prefetch=0,
            grid=(b,),
            in_specs=[
                pl.BlockSpec((1, t, d), lambda ib: (ib, 0, 0)),      # x (one batch)
                pl.BlockSpec((d, 3 * d), lambda ib: (0, 0)),          # fused W_qkv
                pl.BlockSpec((1, 3 * d), lambda ib: (0, 0)),          # fused b_qkv
            ],
            out_specs=pl.BlockSpec((1, t, d), lambda ib: (ib, 0, 0)),  # lane-dense (t, d)
        ),
        compiler_params=pltpu.CompilerParams(
            dimension_semantics=("parallel",)),
    )(x, w_packed, b_packed)


def multihead_attention_ref(x, wk, bk, wq, bq, wv, bv, heads):
    """Pure-JAX f32 reference mirroring the PyTorch forward exactly."""
    b, t, d = x.shape
    hd = d // heads
    keys = x @ wk.T + bk
    queries = x @ wq.T + bq
    values = x @ wv.T + bv
    keys = jnp.swapaxes(keys.reshape(b, t, heads, hd), 1, 2)
    queries = jnp.swapaxes(queries.reshape(b, t, heads, hd), 1, 2)
    values = jnp.swapaxes(values.reshape(b, t, heads, hd), 1, 2)
    scale = float(hd) ** 0.5
    dot = jax.nn.softmax(jnp.matmul(keys, jnp.swapaxes(queries, -1, -2)) / scale, axis=-1)
    out = jnp.swapaxes(dot @ values, 1, 2).reshape(b, t, d)
    return out


if __name__ == "__main__":
    batch, seq, d_model, heads = 2, 8, 32, 4

    key = jax.random.PRNGKey(0)
    kx, k1, k2, k3, k4, k5, k6 = jax.random.split(key, 7)

    x = jax.random.normal(kx, (batch, seq, d_model), dtype=jnp.float32)

    # Deterministic parameter init (torch.nn.Linear-like uniform bound).
    bound = 1.0 / (d_model ** 0.5)
    wk = jax.random.uniform(k1, (d_model, d_model), jnp.float32, -bound, bound)
    bk = jax.random.uniform(k2, (d_model,), jnp.float32, -bound, bound)
    wq = jax.random.uniform(k3, (d_model, d_model), jnp.float32, -bound, bound)
    bq = jax.random.uniform(k4, (d_model,), jnp.float32, -bound, bound)
    wv = jax.random.uniform(k5, (d_model, d_model), jnp.float32, -bound, bound)
    bv = jax.random.uniform(k6, (d_model,), jnp.float32, -bound, bound)

    out = multihead_attention(x, wk, bk, wq, bq, wv, bv, heads)
    out = jax.block_until_ready(out)

    ref = multihead_attention_ref(x, wk, bk, wq, bq, wv, bv, heads)
    # bf16 MXU inputs + approx reciprocal vs. f32 reference -> looser tolerance.
    np.testing.assert_allclose(np.asarray(out), np.asarray(ref), atol=2e-2, rtol=2e-2)

    print("KERNEL_OK")
</pallas_src>

<mosaic_0001>
module attributes {stable_mosaic.version = 11 : i64} {
  func.func @_mha_kernel(%arg0: i32, %arg1: memref<1x8x32xf32, #tpu.memory_space<vmem>>, %arg2: memref<32x96xbf16, #tpu.memory_space<vmem>>, %arg3: memref<1x96xf32, #tpu.memory_space<vmem>>, %arg4: memref<1x8x32xf32, #tpu.memory_space<vmem>>) attributes {dimension_semantics = [#tpu.dimension_semantics<parallel>], iteration_bounds = array<i64: 2>, scalar_prefetch = 0 : i64, scratch_operands = 0 : i64, tpu.core_type = #tpu.core_type<tc>, window_params = [{transform_indices = @transform_0, window_bounds = array<i64: 1, 8, 32>}, {pipeline_mode = #tpu.pipeline_mode<synchronous>, transform_indices = @transform_1, window_bounds = array<i64: 32, 96>}, {pipeline_mode = #tpu.pipeline_mode<synchronous>, transform_indices = @transform_2, window_bounds = array<i64: 1, 96>}, {transform_indices = @transform_3, window_bounds = array<i64: 1, 8, 32>}]} {
    %c0 = arith.constant 0 : index
    %c0_0 = arith.constant 0 : index
    %c0_1 = arith.constant 0 : index
    %0 = vector.load %arg1[%c0, %c0_0, %c0_1] : memref<1x8x32xf32, #tpu.memory_space<vmem>>, vector<1x8x32xf32>
    %1 = vector.shape_cast %0 : vector<1x8x32xf32> to vector<8x32xf32>
    %c0_2 = arith.constant 0 : index
    %c0_3 = arith.constant 0 : index
    %2 = vector.load %arg2[%c0_2, %c0_3] : memref<32x96xbf16, #tpu.memory_space<vmem>>, vector<32x96xbf16>
    %c0_4 = arith.constant 0 : index
    %c0_5 = arith.constant 0 : index
    %3 = vector.load %arg3[%c0_4, %c0_5] : memref<1x96xf32, #tpu.memory_space<vmem>>, vector<1x96xf32>
    %4 = arith.truncf %1 : vector<8x32xf32> to vector<8x32xbf16>
    %cst = arith.constant dense<0.000000e+00> : vector<8x96xf32>
    %5 = tpu.matmul %4, %2, %cst {dimension_numbers = #tpu.dot_dimension_numbers<[1], [0], [0], [1], [0, 0, 1, 1], [], []>} : vector<8x32xbf16>, vector<32x96xbf16>, vector<8x96xf32> -> vector<8x96xf32>
    %6 = vector.broadcast %3 : vector<1x96xf32> to vector<8x96xf32>
    %7 = arith.addf %5, %6 : vector<8x96xf32>
    %8 = vector.extract_strided_slice %7 {offsets = [0, 0], sizes = [8, 32], strides = [1, 1]} : vector<8x96xf32> to vector<8x32xf32>
    %cst_6 = arith.constant 0.353553385 : f32
    %9 = vector.broadcast %cst_6 : f32 to vector<8x32xf32>
    %10 = arith.mulf %8, %9 : vector<8x32xf32>
    %11 = vector.extract_strided_slice %7 {offsets = [0, 32], sizes = [8, 32], strides = [1, 1]} : vector<8x96xf32> to vector<8x32xf32>
    %12 = vector.extract_strided_slice %7 {offsets = [0, 64], sizes = [8, 32], strides = [1, 1]} : vector<8x96xf32> to vector<8x32xf32>
    %13 = vector.extract_strided_slice %10 {offsets = [0, 0], sizes = [8, 8], strides = [1, 1]} : vector<8x32xf32> to vector<8x8xf32>
    %14 = arith.truncf %13 : vector<8x8xf32> to vector<8x8xbf16>
    %15 = vector.extract_strided_slice %11 {offsets = [0, 0], sizes = [8, 8], strides = [1, 1]} : vector<8x32xf32> to vector<8x8xf32>
    %16 = arith.truncf %15 : vector<8x8xf32> to vector<8x8xbf16>
    %17 = vector.extract_strided_slice %12 {offsets = [0, 0], sizes = [8, 8], strides = [1, 1]} : vector<8x32xf32> to vector<8x8xf32>
    %18 = arith.truncf %17 : vector<8x8xf32> to vector<8x8xbf16>
    %cst_7 = arith.constant dense<0.000000e+00> : vector<8x8xf32>
    %19 = tpu.matmul %16, %14, %cst_7 {dimension_numbers = #tpu.dot_dimension_numbers<[1], [1], [0], [0], [0, 0, 1, 0], [], []>} : vector<8x8xbf16>, vector<8x8xbf16>, vector<8x8xf32> -> vector<8x8xf32>
    %cst_8 = arith.constant dense<0xFF800000> : vector<8xf32>
    %20 = vector.multi_reduction <maximumf>, %19, %cst_8 [1] : vector<8x8xf32> to vector<8xf32>
    %21 = vector.shape_cast %20 : vector<8xf32> to vector<8x1xf32>
    %22 = vector.broadcast %21 : vector<8x1xf32> to vector<8x8xf32>
    %23 = arith.subf %19, %22 : vector<8x8xf32>
    %24 = math.exp %23 : vector<8x8xf32>
    %cst_9 = arith.constant dense<0.000000e+00> : vector<8xf32>
    %25 = vector.multi_reduction <add>, %24, %cst_9 [1] : vector<8x8xf32> to vector<8xf32>
    %26 = vector.shape_cast %25 : vector<8xf32> to vector<8x1xf32>
    %27 = arith.truncf %24 : vector<8x8xf32> to vector<8x8xbf16>
    %cst_10 = arith.constant dense<0.000000e+00> : vector<8x8xf32>
    %28 = tpu.matmul %27, %18, %cst_10 {dimension_numbers = #tpu.dot_dimension_numbers<[1], [0], [0], [1], [0, 0, 1, 1], [], []>} : vector<8x8xbf16>, vector<8x8xbf16>, vector<8x8xf32> -> vector<8x8xf32>
    %29 = tpu.reciprocal %26 {approx = true} : vector<8x1xf32> -> vector<8x1xf32>
    %30 = vector.broadcast %29 : vector<8x1xf32> to vector<8x8xf32>
    %31 = arith.mulf %28, %30 : vector<8x8xf32>
    %32 = vector.extract_strided_slice %10 {offsets = [0, 8], sizes = [8, 8], strides = [1, 1]} : vector<8x32xf32> to vector<8x8xf32>
    %33 = arith.truncf %32 : vector<8x8xf32> to vector<8x8xbf16>
    %34 = vector.extract_strided_slice %11 {offsets = [0, 8], sizes = [8, 8], strides = [1, 1]} : vector<8x32xf32> to vector<8x8xf32>
    %35 = arith.truncf %34 : vector<8x8xf32> to vector<8x8xbf16>
    %36 = vector.extract_strided_slice %12 {offsets = [0, 8], sizes = [8, 8], strides = [1, 1]} : vector<8x32xf32> to vector<8x8xf32>
    %37 = arith.truncf %36 : vector<8x8xf32> to vector<8x8xbf16>
    %cst_11 = arith.constant dense<0.000000e+00> : vector<8x8xf32>
    %38 = tpu.matmul %35, %33, %cst_11 {dimension_numbers = #tpu.dot_dimension_numbers<[1], [1], [0], [0], [0, 0, 1, 0], [], []>} : vector<8x8xbf16>, vector<8x8xbf16>, vector<8x8xf32> -> vector<8x8xf32>
    %cst_12 = arith.constant dense<0xFF800000> : vector<8xf32>
    %39 = vector.multi_reduction <maximumf>, %38, %cst_12 [1] : vector<8x8xf32> to vector<8xf32>
    %40 = vector.shape_cast %39 : vector<8xf32> to vector<8x1xf32>
    %41 = vector.broadcast %40 : vector<8x1xf32> to vector<8x8xf32>
    %42 = arith.subf %38, %41 : vector<8x8xf32>
    %43 = math.exp %42 : vector<8x8xf32>
    %cst_13 = arith.constant dense<0.000000e+00> : vector<8xf32>
    %44 = vector.multi_reduction <add>, %43, %cst_13 [1] : vector<8x8xf32> to vector<8xf32>
    %45 = vector.shape_cast %44 : vector<8xf32> to vector<8x1xf32>
    %46 = arith.truncf %43 : vector<8x8xf32> to vector<8x8xbf16>
    %cst_14 = arith.constant dense<0.000000e+00> : vector<8x8xf32>
    %47 = tpu.matmul %46, %37, %cst_14 {dimension_numbers = #tpu.dot_dimension_numbers<[1], [0], [0], [1], [0, 0, 1, 1], [], []>} : vector<8x8xbf16>, vector<8x8xbf16>, vector<8x8xf32> -> vector<8x8xf32>
    %48 = tpu.reciprocal %45 {approx = true} : vector<8x1xf32> -> vector<8x1xf32>
    %49 = vector.broadcast %48 : vector<8x1xf32> to vector<8x8xf32>
    %50 = arith.mulf %47, %49 : vector<8x8xf32>
    %51 = vector.extract_strided_slice %10 {offsets = [0, 16], sizes = [8, 8], strides = [1, 1]} : vector<8x32xf32> to vector<8x8xf32>
    %52 = arith.truncf %51 : vector<8x8xf32> to vector<8x8xbf16>
    %53 = vector.extract_strided_slice %11 {offsets = [0, 16], sizes = [8, 8], strides = [1, 1]} : vector<8x32xf32> to vector<8x8xf32>
    %54 = arith.truncf %53 : vector<8x8xf32> to vector<8x8xbf16>
    %55 = vector.extract_strided_slice %12 {offsets = [0, 16], sizes = [8, 8], strides = [1, 1]} : vector<8x32xf32> to vector<8x8xf32>
    %56 = arith.truncf %55 : vector<8x8xf32> to vector<8x8xbf16>
    %cst_15 = arith.constant dense<0.000000e+00> : vector<8x8xf32>
    %57 = tpu.matmul %54, %52, %cst_15 {dimension_numbers = #tpu.dot_dimension_numbers<[1], [1], [0], [0], [0, 0, 1, 0], [], []>} : vector<8x8xbf16>, vector<8x8xbf16>, vector<8x8xf32> -> vector<8x8xf32>
    %cst_16 = arith.constant dense<0xFF800000> : vector<8xf32>
    %58 = vector.multi_reduction <maximumf>, %57, %cst_16 [1] : vector<8x8xf32> to vector<8xf32>
    %59 = vector.shape_cast %58 : vector<8xf32> to vector<8x1xf32>
    %60 = vector.broadcast %59 : vector<8x1xf32> to vector<8x8xf32>
    %61 = arith.subf %57, %60 : vector<8x8xf32>
    %62 = math.exp %61 : vector<8x8xf32>
    %cst_17 = arith.constant dense<0.000000e+00> : vector<8xf32>
    %63 = vector.multi_reduction <add>, %62, %cst_17 [1] : vector<8x8xf32> to vector<8xf32>
    %64 = vector.shape_cast %63 : vector<8xf32> to vector<8x1xf32>
    %65 = arith.truncf %62 : vector<8x8xf32> to vector<8x8xbf16>
    %cst_18 = arith.constant dense<0.000000e+00> : vector<8x8xf32>
    %66 = tpu.matmul %65, %56, %cst_18 {dimension_numbers = #tpu.dot_dimension_numbers<[1], [0], [0], [1], [0, 0, 1, 1], [], []>} : vector<8x8xbf16>, vector<8x8xbf16>, vector<8x8xf32> -> vector<8x8xf32>
    %67 = tpu.reciprocal %64 {approx = true} : vector<8x1xf32> -> vector<8x1xf32>
    %68 = vector.broadcast %67 : vector<8x1xf32> to vector<8x8xf32>
    %69 = arith.mulf %66, %68 : vector<8x8xf32>
    %70 = vector.extract_strided_slice %10 {offsets = [0, 24], sizes = [8, 8], strides = [1, 1]} : vector<8x32xf32> to vector<8x8xf32>
    %71 = arith.truncf %70 : vector<8x8xf32> to vector<8x8xbf16>
    %72 = vector.extract_strided_slice %11 {offsets = [0, 24], sizes = [8, 8], strides = [1, 1]} : vector<8x32xf32> to vector<8x8xf32>
    %73 = arith.truncf %72 : vector<8x8xf32> to vector<8x8xbf16>
    %74 = vector.extract_strided_slice %12 {offsets = [0, 24], sizes = [8, 8], strides = [1, 1]} : vector<8x32xf32> to vector<8x8xf32>
    %75 = arith.truncf %74 : vector<8x8xf32> to vector<8x8xbf16>
    %cst_19 = arith.constant dense<0.000000e+00> : vector<8x8xf32>
    %76 = tpu.matmul %73, %71, %cst_19 {dimension_numbers = #tpu.dot_dimension_numbers<[1], [1], [0], [0], [0, 0, 1, 0], [], []>} : vector<8x8xbf16>, vector<8x8xbf16>, vector<8x8xf32> -> vector<8x8xf32>
    %cst_20 = arith.constant dense<0xFF800000> : vector<8xf32>
    %77 = vector.multi_reduction <maximumf>, %76, %cst_20 [1] : vector<8x8xf32> to vector<8xf32>
    %78 = vector.shape_cast %77 : vector<8xf32> to vector<8x1xf32>
    %79 = vector.broadcast %78 : vector<8x1xf32> to vector<8x8xf32>
    %80 = arith.subf %76, %79 : vector<8x8xf32>
    %81 = math.exp %80 : vector<8x8xf32>
    %cst_21 = arith.constant dense<0.000000e+00> : vector<8xf32>
    %82 = vector.multi_reduction <add>, %81, %cst_21 [1] : vector<8x8xf32> to vector<8xf32>
    %83 = vector.shape_cast %82 : vector<8xf32> to vector<8x1xf32>
    %84 = arith.truncf %81 : vector<8x8xf32> to vector<8x8xbf16>
    %cst_22 = arith.constant dense<0.000000e+00> : vector<8x8xf32>
    %85 = tpu.matmul %84, %75, %cst_22 {dimension_numbers = #tpu.dot_dimension_numbers<[1], [0], [0], [1], [0, 0, 1, 1], [], []>} : vector<8x8xbf16>, vector<8x8xbf16>, vector<8x8xf32> -> vector<8x8xf32>
    %86 = tpu.reciprocal %83 {approx = true} : vector<8x1xf32> -> vector<8x1xf32>
    %87 = vector.broadcast %86 : vector<8x1xf32> to vector<8x8xf32>
    %88 = arith.mulf %85, %87 : vector<8x8xf32>
    %89 = tpu.concatenate %31, %50, %69, %88 in 1 : vector<8x8xf32>, vector<8x8xf32>, vector<8x8xf32>, vector<8x8xf32> -> vector<8x32xf32>
    %c0_23 = arith.constant 0 : index
    %c0_24 = arith.constant 0 : index
    %c0_25 = arith.constant 0 : index
    %90 = vector.load %arg4[%c0_23, %c0_24, %c0_25] : memref<1x8x32xf32, #tpu.memory_space<vmem>>, vector<1x8x32xf32>
    %91 = vector.shape_cast %90 : vector<1x8x32xf32> to vector<8x32xf32>
    %92 = vector.shape_cast %89 : vector<8x32xf32> to vector<1x8x32xf32>
    tpu.vector_store %arg4[%c0_23, %c0_24, %c0_25], %92 {strides = array<i32>} : memref<1x8x32xf32, #tpu.memory_space<vmem>>, vector<1x8x32xf32>,
    return
  }
  func.func @transform_0(%arg0: i32) -> (i32, i32, i32) {
    %c0_i32 = arith.constant 0 : i32
    %c0_i32_0 = arith.constant 0 : i32
    %c0_i32_1 = arith.constant 0 : i32
    return %arg0, %c0_i32, %c0_i32_0 : i32, i32, i32
  }
  func.func @transform_1(%arg0: i32) -> (i32, i32) {
    %c0_i32 = arith.constant 0 : i32
    %c0_i32_0 = arith.constant 0 : i32
    %c0_i32_1 = arith.constant 0 : i32
    return %c0_i32, %c0_i32_0 : i32, i32
  }
  func.func @transform_2(%arg0: i32) -> (i32, i32) {
    %c0_i32 = arith.constant 0 : i32
    %c0_i32_0 = arith.constant 0 : i32
    %c0_i32_1 = arith.constant 0 : i32
    return %c0_i32, %c0_i32_0 : i32, i32
  }
  func.func @transform_3(%arg0: i32) -> (i32, i32, i32) {
    %c0_i32 = arith.constant 0 : i32
    %c0_i32_0 = arith.constant 0 : i32
    %c0_i32_1 = arith.constant 0 : i32
    return %arg0, %c0_i32, %c0_i32_0 : i32, i32, i32
  }
}

</mosaic_0001>

<bundles_post_ra>
// kernel: tpu_custom_call.1
= control target key start
LH: loop header
LB: loop body
LE: loop exit
PB: predicated region body
PF: predicated region fallthrough
CT: control target
= control target key end

     0   :  { %8 = vsyncpa [#allocation3], 0  ;;  %s1419_s0 = inlined_call_operand.hbm [shape: f32[2,8,32], index: 0, kind: input, shape index: {}]   ;;  %s1420_s1 = inlined_call_operand.hbm [shape: bf16[32,96], index: 1, kind: input, shape index: {}]   ;;  %s1421_s2 = inlined_call_operand.vmem [shape: f32[1,96], index: 2, kind: input, shape index: {}]   ;;  %s1422_s3 = inlined_call_operand.hbm [shape: f32[2,8,32], index: 3, kind: output, shape index: {}]  }
   0x1   :  { %10 = vsyncpa [#allocation3 + $0x1], 0 }
   0x2   :  { %11 = vsyncpa [#allocation6], 0 }
   0x3   :  { %12 = vsyncpa [#allocation4], 0 }
   0x4   :  { %14 = vsyncpa [#allocation4 + $0x1], 0  ;;  %s1187_s12 = smov 0   ;;  %s1189_s13 = smov 0  }
   0x5   :  { %s1191_s14 = smov 0   ;;  %s1193_s15 = smov 0  }
   0x6 LB: > { %s1208_s16 = sadd.s32 4294967295, %s1144_s15   ;;  %s828_s17 = sadd.s32 4294967294, %s1144_s15   ;;  %s1144_s15 = sphi %s1193_s15, %s1444_s15   ;;  %s1140_s14 = sphi %s1191_s14, %s1443_s14   ;;  %s1136_s13 = sphi %s1189_s13, %s1442_s13   ;;  %s1132_s12 = sphi %s1187_s12, %s1441_s12  }
   0x7   : > { %p40_p0 = scmp.ne.s32.totalorder %s1136_s13, %s1132_s12  ;;  %p1423_p1 = scmp.eq.s32.totalorder %s1208_s16, 0 }
   0x8   : > { %p112_p3 = scmp.eq.s32.totalorder %s828_s17, 1  ;;  %p829_p5 = scmp.ge.s32.totalorder %s1144_s15, 1 }
   0x9   : > { %p1217_p4 = por %p1423_p1, %p40_p0  ;;  %p119_p7 = scmp.lt.s32.totalorder %s1144_s15, 3 }
   0xa   : > { %p1222_p6 = por %p112_p3, %p40_p0  ;;  %s1146_s21 = smov [#allocation5]  }
   0xb   : > { %s1427_s18 = scalar_select %p1217_p4, 1, 0 }
   0xc   : > { %s1428_s19 = scalar_select %p1222_p6, 1, 0 }
   0xd   : > { %p1227_p8 = pnand %p829_p5, %p119_p7  ;;  %s131_s22 = sshll.u32 %s1146_s21, 4  ;;  %s132_s22 = int_to_ptr.vmem [resolvable:$true] %s131_s22 }
   0xe   : > { %s1241_s24 = sadd.s32 1, %s1144_s15   ;;  %s27_s25 = sadd.s32 1, %s1140_s14 }
   0xf   : > { %s1429_s20 = scalar_select %p1227_p8, 1, 0 }
  0x10   : > { %p937_p9 = pneg %p1227_p8  ;;  %s24_s26 = ssub.s32 %s1144_s15, %s1241_s24 }
  0x11   : > { %s1033_s27 = scalar_lea.vmem %s132_s22, 256  ;;  %p1041_p5 = scmp.lt.s32.totalorder %s132_s22, %s132_s22 }
  0x12   : > { %p1236_p11 = pnand %p937_p9, %p1423_p1  ;;  %p1034_p13 = scmp.ne.s32.totalorder %s132_s22, %s1033_s27 }
  0x13   : > { %p1042_p7 = scmp.lt.s32.totalorder %s1033_s27, %s1033_s27 }
  0x14   : > { %p1024_p12 = pneg %p1236_p11 }
  0x15   : > { %p1043_p10 = por %p1042_p7, %p1041_p5 }
  0x16   : > { %p1036_p0 = pnand %p1034_p13, %p1024_p12 }
  0x18   : > { %p1037_p3 = pneg %p1036_p0 }
  0x1a   : > { %p1044_p2 = pnand %p1043_p10, %p1037_p3 }
  0x1c   : > { %1047 = shalt.err (!%p1044_p2)
}
  0x1d   : > { %s1147_s28 = smov 64   ;;  %s1148_s29 = smov 4  }
  0x1e   : > { %940 = dma.hbm_to_vmem [thread:$0]  (!%p1236_p11), %s1420_s1, 256, %s132_s22, [#allocation6], %s1147_s28, %s1147_s28, %s1148_s29  }
  0x1f   : > { %p25_p9 = scmp.eq.s32.totalorder %s24_s26, 0  ;;  %p34_p12 = scmp.ne.s32.totalorder %s1140_s14, %s1136_s13 }
  0x20   : > { %p35_p10 = scmp.eq.s32.totalorder %s1144_s15, 0  ;;  %p950_p2 = scmp.lt.s32.totalorder %s1144_s15, 2 }
  0x21   : > { %s1258_s5 = scalar_select %p25_p9, %s1140_s14, %s27_s25  }
  0x22   : > { %p36_p13 = por %p35_p10, %p34_p12  ;;  %p1431_p0 = scmp.eq.s32.totalorder %s1208_s16, 1 }
  0x23   : > { %s148_s7 = sand.u32 1, %s1140_s14   ;;  %s833_s8 = sshll.u32 %s1144_s15, 7 }
  0x24   : > { %p1262_p3 = por %p1431_p0, %p34_p12  ;;  %s832_s9 = sshll.u32 %s148_s7, 3 }
  0x25   : > { %s1271_s17 = scalar_lea.hbm %s1419_s0, %s833_s8  ;;  %s152_s21 = scalar_lea.vmem [#allocation2], %s832_s9 }
  0x26   : > { %s1432_s6 = scalar_select %p1262_p3, 1, 0 }
  0x27   : > { %s159_s22 = sshll.u32 %s152_s21, 4  ;;  %p1273_p11 = pnand %p950_p2, %p36_p13  ;;  %s160_s22 = int_to_ptr.vmem [resolvable:$true] %s159_s22 }
  0x28   : > { %s149_s25 = scalar_lea.sflag [#allocation3], %s148_s7  ;;  %s1048_s26 = scalar_lea.hbm %s1271_s17, 128 }
  0x29   : > { %p1049_p5 = scmp.ne.s32.totalorder %s1271_s17, %s1048_s26  ;;  %p1050_p7 = pneg %p1273_p11 }
  0x2a   : > { %s1053_s29 = scalar_lea.hbm %s1419_s0, 256  ;;  %p1054_p10 = scmp.lt.s32.totalorder %s1271_s17, %s1419_s0 }
  0x2b   : > { %p1051_p9 = pnand %p1050_p7, %p1049_p5  ;;  %p1055_p2 = scmp.lt.s32.totalorder %s1053_s29, %s1048_s26 }
  0x2d   : > { %p1052_p12 = pneg %p1051_p9  ;;  %p1056_p13 = por %p1055_p2, %p1054_p10 }
  0x2f   : > { %p1057_p0 = pnand %p1056_p13, %p1052_p12 }
  0x31   : > { %1060 = shalt.err (!%p1057_p0)
}
  0x32   : > { %s1061_s8 = scalar_lea.vmem %s160_s22, 128  ;;  %s1149_s7 = smov [#allocation2]  }
  0x33   : > { %p1062_p1 = scmp.ne.s32.totalorder %s160_s22, %s1061_s8  ;;  %s1066_s9 = sshll.u32 %s1149_s7, 4  ;;  %s1067_s9 = int_to_ptr.vmem [resolvable:$false] %s1066_s9 }
  0x34   : > { %s1068_s10 = scalar_lea.vmem %s1067_s9, 256  ;;  %p1069_p5 = scmp.lt.s32.totalorder %s160_s22, %s1067_s9 }
  0x35   : > { %p1064_p6 = pnand %p1062_p1, %p1050_p7  ;;  %p1070_p9 = scmp.lt.s32.totalorder %s1068_s10, %s1061_s8 }
  0x37   : > { %p1065_p3 = pneg %p1064_p6  ;;  %p1071_p4 = por %p1070_p9, %p1069_p5 }
  0x39   : > { %p1072_p8 = pnand %p1071_p4, %p1065_p3 }
  0x3b   : > { %1075 = shalt.err (!%p1072_p8)
}
  0x3c   : > { %944 = dma.hbm_to_vmem [thread:$0]  (!%p1273_p11), %s1271_s17, 128, %s160_s22, %s149_s25  }
  0x3d   : > { %p1434_p12 = scmp.ne.s32.totalorder %s1429_s20, 0 }
  0x3e   : > { %s1294_s11 = sand.u32 (!%p1434_p12), 1, %s1136_s13   ;;  %p1435_p1 = scmp.ne.s32.totalorder (!%p1434_p12), %s1427_s18, 0 }
  0x3f   : > { %168 = sbr.rel (%p1434_p12) target bundleno = 1123 (0x463), region = 32  ;;  %s835_s21 = sshll.u32 (!%p1434_p12), %s1294_s11, 3 }
  0x40   : > { %s171_s26 = scalar_lea.sflag (!%p1434_p12), [#allocation3], %s1294_s11  ;;  %s174_s27 = scalar_lea.vmem (!%p1434_p12), [#allocation2], %s835_s21 }
  0x44   : > { %1119 = dma.done.wait (%p1435_p1), %s171_s26, 128  }
  0x45   : > { %1121 = vsyncadd (%p1435_p1), %s171_s26, 4294967168  ;;  %p1436_p4 = scmp.eq.s32.totalorder %s1208_s16, 0 }
  0x47   : > { %1123 = dma.done.wait (%p1436_p4), [#allocation6], 256   ;;  %p1437_p6 = pmov %p1436_p4 }
  0x48   : > { %v1150_v0 = vmov 0.0   ;;  %vm1151_vm0 = vmmov 0   ;;  %v1004_v1 = vld [vmem:[#allocation5 + $0x8] sm:$0xff]   ;;  %v1005_v2 = vld [vmem:[#allocation5] sm:$0xff]   ;;  %v202_v3 = vld [vmem:[%s174_s27] sm:$0xff]  ;;  %vm227_vm1 = vcmask 261120  }
  0x49   : > { %1125 = vsyncadd (%p1437_p6), [#allocation6], 4294967040  ;;  %873 = vmatprep.subr.bf16.mxu0 %v1150_v0  ;;  %877 = vmatprep.mubr.msk.bf16.mxu0 %vm1151_vm0, %v1150_v0  ;;  %v208_v4 = vpack.c.bf16 %v202_v3, %v202_v3  ;;  %v838_v5 = vld [vmem:[%s1421_s2] ss:$0 sm:$0xff]  ;;  %vm277_vm2 = vcmask 64512   ;;  %s1152_s17 = smov 88  }
  0x4a   : > { %881 = vmatprep.subr.bf16.mxu1 %v1150_v0  ;;  %883 = vmatprep.mubr.msk.bf16.mxu1 %vm1151_vm0, %v1150_v0  ;;  %s1153_s22 = smov 96   ;;  %s1154_s23 = smov 112   ;;  %vm339_vm3 = vcmask 1043456   ;;  %vm729_vm4 = vcmask 130048   ;;  %vm731_vm5 = vcmask 195584  }
  0x4b   : > { %874 = vmatpush3.bf16.msra.mxu0 %v1004_v1  ;;  %s1155_s25 = smov 120   ;;  %s1156_s28 = smov 104  }
  0x4c   : > { %875 = vmatprep.subr.bf16.mxu0 %v1150_v0  ;;  %s1157_s29 = smov 80   ;;  %s1158_s30 = smov 72  }
  0x4d   : > { %s1159_s4 = smov 56   ;;  %s1160_s8 = smov 64  }
  0x4e   : > { %s1161_s7 = smov 40   ;;  %s1162_s9 = smov 48  }
  0x4f   : > { %876 = vmatpush3.bf16.msra.mxu0 %v1005_v2  ;;  %s1163_s10 = smov 8   ;;  %s1164_s26 = smov 16  }
  0x50   : > { %887 = vmatprep.subr.bf16.mxu0 %v1150_v0  ;;  %s1165_s27 = smov 24   ;;  %s851_s18 = sshll.u32 %s1208_s16, 7 }
  0x51   : > { %s200_s20 = scalar_lea.vmem [#allocation7], %s835_s21  ;;  %p1438_p3 = scmp.ne.s32.totalorder %s1432_s6, 0 }
  0x52   : > { %878 = vmatmul.mubr.msk.bf16.vlgmr.msra.gmra.mxu0 %vm227_vm1, %v208_v4  ;;  %s1166_s16 = smov [#allocation7]  }
  0x53   : > { %889 = vmatprep.mubr.msk.bf16.mxu0 %vm1151_vm0, %v1150_v0  ;;  %s1080_s21 = sshll.u32 %s1166_s16, 4  ;;  %s1081_s21 = int_to_ptr.vmem [resolvable:$false] %s1080_s21 }
 0x112   : > { %v265_v6 = vpop.f32.mrf.mxu0 }
 0x113   : > { %v266_v7 = vadd.f32 %v838_v5, %v265_v6 }
 0x114   : > { %v879_v8 = vpop.f32.mrf.mxu0 }
 0x115   : > { %v271_v9 = vmul.f32 0.35355338, %v266_v7  ;;  %v1322_v10 = vpack.c.bf16 %v266_v7, %v266_v7 }
 0x116   : > { %v268_v11 = vpop.f32.mrf.mxu0 }
 0x117   : > { %v272_v12 = vpack.c.bf16 %v271_v9, %v271_v9  ;;  %385 = vrot.lane.b32.xlu1 %v1322_v10, %s1152_s17  ;;  %275 = vrot.lane.b32.xlu0 %v1322_v10, %s1153_s22  ;;  %s748_s17 = sshll.u32 %s200_s20, 4  ;;  %s749_s17 = int_to_ptr.vmem [resolvable:$true] %s748_s17 }
 0x118   : > { %v880_v13 = vpop.f32.mrf.mxu0  ;;  %p1083_p10 = scmp.lt.s32.totalorder %s749_s17, %s1081_s21 }
 0x119   : > { %v282_v14 = vsel %vm277_vm2, %v272_v12, 0 }
 0x11a   : > { %882 = vmatpush3.bf16.xpose.msra.mxu1 %v282_v14 }
 0x11b   : > { %498 = vrot.lane.b32.xlu1 %v272_v12, %s1154_s23  ;;  %388 = vrot.lane.b32.xlu0 %v272_v12, %s1155_s25  ;;  %s1381_s25 = scalar_lea.hbm %s1422_s3, %s851_s18 }
 0x11c   : > { %893 = vmatprep.subr.bf16.mxu1 %v1150_v0 }
 0x11f   : > { %608 = vrot.lane.b32.xlu1 %v272_v12, %s1156_s28  ;;  %496 = vrot.lane.b32.xlu0 %v1322_v10, %s1157_s29  ;;  %s735_s28 = scalar_lea.sflag [#allocation4], %s1294_s11  ;;  %s1076_s29 = scalar_lea.vmem %s749_s17, 128 }
 0x120   : > { %p1077_p8 = scmp.ne.s32.totalorder %s749_s17, %s1076_s29 }
 0x122   : > { %p1078_p11 = pnand %p1077_p8, %p1438_p3 }
 0x123   : > { %606 = vrot.lane.b32.xlu0 %v1322_v10, %s1158_s30  ;;  %s1082_s30 = scalar_lea.vmem %s1081_s21, 256 }
 0x124   : > { %p1079_p7 = pneg %p1078_p11  ;;  %p1084_p2 = scmp.lt.s32.totalorder %s1082_s30, %s1076_s29 }
 0x126   : > { %p1085_p13 = por %p1084_p2, %p1083_p10 }
 0x128   : > { %p1086_p0 = pnand %p1085_p13, %p1079_p7 }
 0x189   : > { %v276_v15 = vpop.permute.xlu0 %275  ;;  %v386_v16 = vpop.permute.xlu1 %385 }
 0x18a   : > { %884 = vmatmul.mubr.msk.bf16.vlgmr.msra.gmra.mxu1 %vm277_vm2, %v276_v15 }
 0x18b   : > { %895 = vmatprep.mubr.msk.bf16.mxu1 %vm1151_vm0, %v1150_v0 }
 0x18d   : > { %v389_v17 = vpop.permute.xlu0 %388  ;;  %v499_v19 = vpop.permute.xlu1 %498 }
 0x18e   : > { %v394_v18 = vsel %vm277_vm2, %v389_v17, 0  ;;  %v504_v20 = vsel %vm277_vm2, %v499_v19, 0 }
 0x18f   : > { %894 = vmatpush3.bf16.xpose.msra.mxu1 %v394_v18 }
 0x190   : > { %905 = vmatprep.subr.bf16.mxu1 %v1150_v0 }
 0x191   : > { %v609_v21 = vpop.permute.xlu1 %608  ;;  %v497_v22 = vpop.permute.xlu0 %496 }
 0x192   : > { %v614_v23 = vsel %vm277_vm2, %v609_v21, 0 }
 0x195   : > { %v607_v24 = vpop.permute.xlu0 %606 }
 0x196   : > { %896 = vmatmul.mubr.msk.bf16.vlgmr.msra.gmra.mxu1 %vm277_vm2, %v386_v16 }
 0x197   : > { %906 = vmatpush3.bf16.xpose.msra.mxu1 %v504_v20  ;;  %907 = vmatprep.mubr.msk.bf16.mxu1 %vm1151_vm0, %v1150_v0 }
 0x198   : > { %917 = vmatprep.subr.bf16.mxu1 %v1150_v0 }
 0x19e   : > { %908 = vmatmul.mubr.msk.bf16.vlgmr.msra.gmra.mxu1 %vm277_vm2, %v497_v22 }
 0x19f   : > { %918 = vmatpush3.bf16.xpose.msra.mxu1 %v614_v23  ;;  %919 = vmatprep.mubr.msk.bf16.mxu1 %vm1151_vm0, %v1150_v0 }
 0x1a6   : > { %920 = vmatmul.mubr.msk.bf16.vlgmr.msra.gmra.mxu1 %vm277_vm2, %v607_v24 }
 0x24a   : > { %v318_v25 = vpop.f32.mrf.mxu1 }
 0x24b   : > { %v324_v26 = vsel %vm277_vm2, %v318_v25, -inf }
 0x24c   : > { %325 = vmax.xlane.f32.xlu1 %v324_v26  ;;  %v885_v27 = vpop.f32.mrf.mxu1 }
 0x24e   : > { %v321_v28 = vpop.f32.mrf.mxu1 }
 0x250   : > { %v886_v29 = vpop.f32.mrf.mxu1 }
 0x256   : > { %v430_v30 = vpop.f32.mrf.mxu1 }
 0x257   : > { %v436_v31 = vsel %vm277_vm2, %v430_v30, -inf }
 0x258   : > { %437 = vmax.xlane.f32.xlu0 %v436_v31  ;;  %v897_v32 = vpop.f32.mrf.mxu1 }
 0x25a   : > { %v433_v33 = vpop.f32.mrf.mxu1 }
 0x25c   : > { %v898_v34 = vpop.f32.mrf.mxu1 }
 0x25d   : > { %446 = vrot.lane.b32.xlu1 %v1322_v10, %s1159_s4 }
 0x25e   : > { %v540_v35 = vpop.f32.mrf.mxu1 }
 0x25f   : > { %v546_v36 = vsel %vm277_vm2, %v540_v35, -inf }
 0x260   : > { %547 = vmax.xlane.f32.xlu0 %v546_v36  ;;  %v909_v37 = vpop.f32.mrf.mxu1 }
 0x262   : > { %v543_v38 = vpop.f32.mrf.mxu1 }
 0x264   : > { %v910_v39 = vpop.f32.mrf.mxu1 }
 0x266   : > { %v650_v40 = vpop.f32.mrf.mxu1 }
 0x267   : > { %v656_v44 = vsel %vm277_vm2, %v650_v40, -inf }
 0x268   : > { %v921_v41 = vpop.f32.mrf.mxu1 }
 0x26a   : > { %v653_v42 = vpop.f32.mrf.mxu1 }
 0x26c   : > { %v922_v43 = vpop.f32.mrf.mxu1 }
 0x276   : > { %334 = vrot.lane.b32.xlu0 %v1322_v10, %s1160_s8 }
 0x27a   : > { %666 = vrot.lane.b32.xlu0 %v1322_v10, %s1161_s7 }
 0x281   : > { %657 = vmax.xlane.f32.xlu1 %v656_v44 }
 0x292   : > { %556 = vrot.lane.b32.xlu1 %v1322_v10, %s1162_s9 }
 0x2d5   : > { %v326_v45 = vpop.xlane.xlu1 %325 }
 0x2d6   : > { %v327_v46 = vsub.f32 %v318_v25, %v326_v45 }
 0x2d8   : > { %v328_v47 = vmul.f32 1.442695, %v327_v46 }
 0x2d9   : > { %v447_v57 = vpop.permute.xlu1 %446 }
 0x2da   : > { %1006 = vpow2.f32 %v328_v47  ;;  %v452_v59 = vsel %vm339_vm3, %v447_v57, 0 }
 0x2e1   : > { %v438_v48 = vpop.xlane.xlu0 %437 }
 0x2e2   : > { %v439_v49 = vsub.f32 %v430_v30, %v438_v48 }
 0x2e4   : > { %v440_v50 = vmul.f32 1.442695, %v439_v49 }
 0x2e6   : > { %1008 = vpow2.f32 %v440_v50 }
 0x2e7   : > { %v1007_v54 = vpop.eup %1006 }
 0x2e8   : > { %v333_v58 = vpack.c.bf16 %v1007_v54, %v1007_v54  ;;  %v330_v62 = vsel %vm277_vm2, %v1007_v54, 0.0 }
 0x2e9   : > { %v548_v51 = vpop.xlane.xlu0 %547 }
 0x2ea   : > { %v549_v52 = vsub.f32 %v540_v35, %v548_v51 }
 0x2ec   : > { %v550_v53 = vmul.f32 1.442695, %v549_v52 }
 0x2ed   : > { %v335_v55 = vpop.permute.xlu0 %334 }
 0x2ee   : > { %1010 = vpow2.f32 %v550_v53  ;;  %v341_v56 = vsel %vm339_vm3, %v335_v55, 0 }
 0x2ef   : > { %888 = vmatpush3.bf16.msra.mxu0 %v341_v56 }
 0x2f0   : > { %899 = vmatprep.subr.bf16.mxu0 %v1150_v0 }
 0x2f1   : > { %v667_v8 = vpop.permute.xlu0 %666 }
 0x2f2   : > { %890 = vmatmul.mubr.msk.bf16.vlgmr.msra.gmra.mxu0 %vm277_vm2, %v333_v58  ;;  %v672_v10 = vsel %vm339_vm3, %v667_v8, 0 }
 0x2f3   : > { %v1009_v60 = vpop.eup %1008  ;;  %900 = vmatpush3.bf16.msra.mxu0 %v452_v59  ;;  %901 = vmatprep.mubr.msk.bf16.mxu0 %vm1151_vm0, %v1150_v0 }
 0x2f4   : > { %v442_v61 = vsel %vm277_vm2, %v1009_v60, 0.0  ;;  %911 = vmatprep.subr.bf16.mxu0 %v1150_v0  ;;  %v445_v63 = vpack.c.bf16 %v1009_v60, %v1009_v60 }
 0x2f5   : > { %443 = vadd.xlane.f32.xlu1 %v442_v61 }
 0x2f9   : > { %331 = vadd.xlane.f32.xlu1 %v330_v62 }
 0x2fa   : > { %902 = vmatmul.mubr.msk.bf16.vlgmr.msra.gmra.mxu0 %vm277_vm2, %v445_v63 }
 0x2fb   : > { %v1011_v1 = vpop.eup %1010  ;;  %913 = vmatprep.mubr.msk.bf16.mxu0 %vm1151_vm0, %v1150_v0 }
 0x2fc   : > { %v552_v2 = vsel %vm277_vm2, %v1011_v1, 0.0  ;;  %v555_v9 = vpack.c.bf16 %v1011_v1, %v1011_v1 }
 0x2fd   : > { %553 = vadd.xlane.f32.xlu0 %v552_v2 }
 0x30a   : > { %v658_v3 = vpop.xlane.xlu1 %657 }
 0x30b   : > { %v659_v4 = vsub.f32 %v650_v40, %v658_v3 }
 0x30d   : > { %v660_v5 = vmul.f32 1.442695, %v659_v4 }
 0x30e   : > { %v557_v6 = vpop.permute.xlu1 %556 }
 0x30f   : > { %1012 = vpow2.f32 %v660_v5  ;;  %v562_v7 = vsel %vm339_vm3, %v557_v6, 0 }
 0x310   : > { %912 = vmatpush3.bf16.msra.mxu0 %v562_v7 }
 0x311   : > { %923 = vmatprep.subr.bf16.mxu0 %v1150_v0 }
 0x313   : > { %914 = vmatmul.mubr.msk.bf16.vlgmr.msra.gmra.mxu0 %vm277_vm2, %v555_v9 }
 0x314   : > { %924 = vmatpush3.bf16.msra.mxu0 %v672_v10  ;;  %925 = vmatprep.mubr.msk.bf16.mxu0 %vm1151_vm0, %v1150_v0 }
 0x31c   : > { %v1013_v11 = vpop.eup %1012 }
 0x31d   : > { %v662_v12 = vsel %vm277_vm2, %v1013_v11, 0.0  ;;  %v665_v13 = vpack.c.bf16 %v1013_v11, %v1013_v11 }
 0x31e   : > { %663 = vadd.xlane.f32.xlu0 %v662_v12 }
 0x31f   : > { %926 = vmatmul.mubr.msk.bf16.vlgmr.msra.gmra.mxu0 %vm277_vm2, %v665_v13 }
 0x37e   : > { %v444_v14 = vpop.xlane.xlu1 %443 }
 0x37f   : > { %1014 = vrcp.f32 %v444_v14 }
 0x382   : > { %v332_v38 = vpop.xlane.xlu1 %331 }
 0x386   : > { %v554_v24 = vpop.xlane.xlu0 %553 }
 0x387   : > { %1016 = vrcp.f32 %v554_v24 }
 0x38c   : > { %v1015_v19 = vpop.eup %1014 }
 0x394   : > { %v1017_v26 = vpop.eup %1016 }
 0x3a7   : > { %v664_v25 = vpop.xlane.xlu0 %663 }
 0x3a8   : > { %1018 = vrcp.f32 %v664_v25 }
 0x3a9   : > { %1020 = vrcp.f32 %v332_v38 }
 0x3b2   : > { %v377_v15 = vpop.f32.mrf.mxu0 }
 0x3b4   : > { %v891_v16 = vpop.f32.mrf.mxu0 }
 0x3b5   : > { %v1019_v32 = vpop.eup %1018 }
 0x3b6   : > { %v380_v17 = vpop.f32.mrf.mxu0  ;;  %v1021_v39 = vpop.eup %1020 }
 0x3b7   : > { %v384_v42 = vmul.f32 %v1021_v39, %v377_v15 }
 0x3b8   : > { %v892_v18 = vpop.f32.mrf.mxu0 }
 0x3ba   : > { %v488_v20 = vpop.f32.mrf.mxu0 }
 0x3bb   : > { %v495_v21 = vmul.f32 %v1015_v19, %v488_v20 }
 0x3bc   : > { %v903_v22 = vpop.f32.mrf.mxu0 }
 0x3bd   : > { %717 = vrot.lane.b32.xlu0 %v495_v21, %s1163_s10 }
 0x3be   : > { %v491_v0 = vpop.f32.mrf.mxu0 }
 0x3c0   : > { %v904_v23 = vpop.f32.mrf.mxu0 }
 0x3d3   : > { %v598_v27 = vpop.f32.mrf.mxu0 }
 0x3d4   : > { %v605_v28 = vmul.f32 %v1017_v26, %v598_v27 }
 0x3d5   : > { %v915_v29 = vpop.f32.mrf.mxu0 }
 0x3d6   : > { %721 = vrot.lane.b32.xlu1 %v605_v28, %s1164_s26 }
 0x3d7   : > { %v601_v30 = vpop.f32.mrf.mxu0 }
 0x3d9   : > { %v916_v31 = vpop.f32.mrf.mxu0 }
 0x3df   : > { %v708_v33 = vpop.f32.mrf.mxu0 }
 0x3e0   : > { %v715_v34 = vmul.f32 %v1019_v32, %v708_v33 }
 0x3e1   : > { %v927_v35 = vpop.f32.mrf.mxu0 }
 0x3e2   : > { %725 = vrot.lane.b32.xlu1 %v715_v34, %s1165_s27 }
 0x3e3   : > { %v711_v36 = vpop.f32.mrf.mxu0 }
 0x3e5   : > { %v928_v37 = vpop.f32.mrf.mxu0 }
 0x42f   : > { %v718_v40 = vpop.permute.xlu0 %717 }
 0x430   : > { %v728_v43 = vsel %vm277_vm2, %v384_v42, %v718_v40 }
 0x448   : > { %v722_v41 = vpop.permute.xlu1 %721 }
 0x449   : > { %v730_v44 = vsel %vm729_vm4, %v728_v43, %v722_v41 }
 0x454   : > { %v726_v45 = vpop.permute.xlu1 %725 }
 0x455   : > { %v732_v46 = vsel %vm731_vm5, %v730_v44, %v726_v45 }
 0x456   : > { %733 = vst.msk [vmem:[%s200_s20] sm:$0xff] %vm227_vm1, %v732_v46 }
 0x457   : > { %1089 = shalt.err (!%p1086_p0)
}
 0x458   : > { %s1090_s4 = scalar_lea.hbm %s1381_s25, 128  ;;  %s1094_s7 = scalar_lea.hbm %s1422_s3, 256 }
 0x459   : > { %p1091_p5 = scmp.ne.s32.totalorder %s1381_s25, %s1090_s4  ;;  %p1095_p1 = scmp.lt.s32.totalorder %s1381_s25, %s1422_s3 }
 0x45a   : > { %p1096_p4 = scmp.lt.s32.totalorder %s1094_s7, %s1090_s4 }
 0x45b   : > { %p1092_p9 = pnand %p1091_p5, %p1438_p3 }
 0x45c   : > { %p1097_p6 = por %p1096_p4, %p1095_p1 }
 0x45d   : > { %p1093_p12 = pneg %p1092_p9 }
 0x45f   : > { %p1098_p8 = pnand %p1097_p6, %p1093_p12 }
 0x461   : > { %1101 = shalt.err (!%p1098_p8)
}
 0x462   : > { %935 = dma.vmem_to_hbm [thread:$0]  (%p1438_p3), %s749_s17, 128, %s1381_s25, %s735_s28  }
 0x463 PF: > { %s760_s26 = sand.u32 1, %s1132_s12   ;;  %p1439_p11 = scmp.ne.s32.totalorder %s1428_s19, 0 }
 0x464   : > { %p1440_p7 = scmp.ge.s32.totalorder %s1144_s15, 2  ;;  %s761_s27 = scalar_lea.sflag [#allocation4], %s760_s26 }
 0x466   : > { %p946_p10 = pnand %p1440_p7, %p1439_p11 }
 0x468   : > { %p947_p2 = pneg %p946_p10 }
 0x46a   : > { %1127 = dma.done.wait (%p947_p2), %s761_s27, 128  }
 0x46b   : > { %1129 = vsyncadd (%p947_p2), %s761_s27, 4294967168  ;;  %p17_p13 = scmp.ge.s32.totalorder %s1241_s24, 4   ;;  %s1441_s12 = smov %s1136_s13 }
 0x46c   : > { %s1442_s13 = smov %s1140_s14  ;;  %s1443_s14 = smov %s1258_s5 }
 0x46d   : > { %s1444_s15 = smov %s1241_s24  ;;  %19 = sbr.rel (!%p17_p13) target bundleno = 6 (0x6), region = 81 }
 0x472   :  { %766 = vsyncpa [#allocation3], 1 }
 0x473   :  { %768 = vsyncpa [#allocation3 + $0x1], 1 }
 0x474   :  { %769 = vsyncpa [#allocation6], 1 }
 0x475   :  { %770 = vsyncpa [#allocation4], 1 }
 0x476   :  { %772 = vsyncpa [#allocation4 + $0x1], 1 }

</bundles_post_ra>
